<compile_context>
chip_gen: v7x
topology: tpu7x:2x2x1
jax: 0.10.0
libtpu: 0.0.40
codegen_flags: <defaults>
</compile_context>

<pallas_src>
import jax
import jax.numpy as jnp
from jax.experimental import pallas as pl
from jax.experimental.pallas import tpu as pltpu


LANE = 128  # lane-dense output slab width


def critic_kernel(s_ref, a_ref, w1s_ref, w1a_ref, b1_ref,
                  w2_ref, b2_ref, w3_ref, b3_ref, q_ref):
    """Fused 3-layer MLP over one batch tile.

    fc1 is computed as a split matmul (state@W1s + action@W1a) so the wrapper
    never materializes the concatenated state_action tensor in HBM.
    fc3 (output width 1) is a VPU multiply + lane reduction; a 1-column MXU
    pass would waste the whole output tile and still pay full push/pop latency.
    """
    h1 = jnp.dot(s_ref[...], w1s_ref[...], preferred_element_type=jnp.float32)
    h1 = h1 + jnp.dot(a_ref[...], w1a_ref[...], preferred_element_type=jnp.float32)
    h1 = jnp.maximum(h1 + b1_ref[...], 0.0)                                 # (TB, 128)

    h2 = jnp.dot(h1, w2_ref[...], preferred_element_type=jnp.float32)
    h2 = jnp.maximum(h2 + b2_ref[...], 0.0)                                 # (TB, 64)

    # fc3 as elementwise multiply + cross-lane sum (XLU slot is idle here).
    q = jnp.sum(h2 * w3_ref[...], axis=-1, keepdims=True) + b3_ref[...]     # (TB, 1)

    # Lane-dense store: fill the whole (TB, 128) output slab so the store is
    # an unmasked vst; the wrapper slices lane 0.
    q_ref[...] = jnp.broadcast_to(q, q_ref.shape)


def critic_forward(state, action, params, *, batch_tile=512):
    """Wrapper: batch-tiled pallas_call; weights stay resident in VMEM."""
    w1_s, w1_a, b1, w2, b2, w3, b3 = params
    B, state_dim = state.shape
    _, action_dim = action.shape
    H1 = w1_s.shape[1]
    H2 = w2.shape[1]

    # Batch tile: full batch if small (block == full dim is always legal),
    # otherwise 512 rows (multiple of 8; safe for v7x's 64 MiB VMEM too).
    TB = B if B <= batch_tile else batch_tile
    nb = pl.cdiv(B, TB)

    def tiled(shape):      # batch-tiled operand: walks the batch axis
        return pl.BlockSpec(shape, lambda i: (i, 0))

    def resident(shape):   # whole-array operand: same block every grid step
        return pl.BlockSpec(shape, lambda i: (0, 0))

    q_pad = pl.pallas_call(
        critic_kernel,
        out_shape=jax.ShapeDtypeStruct((B, LANE), jnp.float32),
        grid=(nb,),
        in_specs=[
            tiled((TB, state_dim)),
            tiled((TB, action_dim)),
            resident((state_dim, H1)),
            resident((action_dim, H1)),
            resident((1, H1)),
            resident((H1, H2)),
            resident((1, H2)),
            resident((1, H2)),   # w3 stored as a (1, 64) row for lane reduction
            resident((1, 1)),
        ],
        out_specs=tiled((TB, LANE)),
        compiler_params=pltpu.CompilerParams(
            dimension_semantics=("parallel",),
        ),
    )(state, action, w1_s, w1_a, b1, w2, b2, w3, b3)

    return q_pad[:, :1]


def init_critic_params(key, state_dim, action_dim):
    """PyTorch nn.Linear-style init: U(-1/sqrt(fan_in), 1/sqrt(fan_in)).
    fc1 weight is stored split into (state_dim, 128) and (action_dim, 128)
    halves; all weights are (in_features, out_features); biases are (1, out);
    fc3 weight is stored as a (1, 64) row."""
    H1, H2 = 128, 64
    fan1 = state_dim + action_dim
    key, k1, kb1, k2, kb2, k3, kb3 = jax.random.split(key, 7)

    bnd1 = 1.0 / jnp.sqrt(float(fan1))
    w1 = jax.random.uniform(k1, (fan1, H1), jnp.float32, -bnd1, bnd1)
    b1 = jax.random.uniform(kb1, (1, H1), jnp.float32, -bnd1, bnd1)

    bnd2 = 1.0 / jnp.sqrt(float(H1))
    w2 = jax.random.uniform(k2, (H1, H2), jnp.float32, -bnd2, bnd2)
    b2 = jax.random.uniform(kb2, (1, H2), jnp.float32, -bnd2, bnd2)

    bnd3 = 1.0 / jnp.sqrt(float(H2))
    w3 = jax.random.uniform(k3, (H2, 1), jnp.float32, -bnd3, bnd3)
    b3 = jax.random.uniform(kb3, (1, 1), jnp.float32, -bnd3, bnd3)

    w1_s, w1_a = w1[:state_dim], w1[state_dim:]
    return (w1_s, w1_a, b1, w2, b2, w3.T, b3)   # w3 as (1, 64) row


def critic_reference(state, action, params):
    """Pure-JAX reference (identical math to the PyTorch module)."""
    w1_s, w1_a, b1, w2, b2, w3_row, b3 = params
    sa = jnp.concatenate([state, action], axis=1)
    w1 = jnp.concatenate([w1_s, w1_a], axis=0)
    h1 = jnp.maximum(sa @ w1 + b1, 0.0)
    h2 = jnp.maximum(h1 @ w2 + b2, 0.0)
    return h2 @ w3_row.T + b3


if __name__ == "__main__":
    # Small shapes consistent with the module: batch=8, state_dim=12, action_dim=4.
    B, STATE_DIM, ACTION_DIM = 8, 12, 4

    key = jax.random.PRNGKey(0)
    key, ks, ka, kp = jax.random.split(key, 4)
    state = jax.random.normal(ks, (B, STATE_DIM), jnp.float32)
    action = jax.random.normal(ka, (B, ACTION_DIM), jnp.float32)
    params = init_critic_params(kp, STATE_DIM, ACTION_DIM)

    q = jax.jit(critic_forward)(state, action, params)
    q = jax.block_until_ready(q)

    q_ref = critic_reference(state, action, params)
    assert q.shape == (B, 1), q.shape
    assert jnp.allclose(q, q_ref, atol=1e-5, rtol=1e-5), "mismatch vs reference"

    print("KERNEL_OK")
</pallas_src>

<mosaic_0001>
module attributes {stable_mosaic.version = 11 : i64} {
  func.func @critic_kernel(%arg0: i32, %arg1: memref<8x12xf32, #tpu.memory_space<vmem>>, %arg2: memref<8x4xf32, #tpu.memory_space<vmem>>, %arg3: memref<12x128xf32, #tpu.memory_space<vmem>>, %arg4: memref<4x128xf32, #tpu.memory_space<vmem>>, %arg5: memref<1x128xf32, #tpu.memory_space<vmem>>, %arg6: memref<128x64xf32, #tpu.memory_space<vmem>>, %arg7: memref<1x64xf32, #tpu.memory_space<vmem>>, %arg8: memref<1x64xf32, #tpu.memory_space<vmem>>, %arg9: memref<1x1xf32, #tpu.memory_space<vmem>>, %arg10: memref<8x128xf32, #tpu.memory_space<vmem>>) attributes {dimension_semantics = [#tpu.dimension_semantics<parallel>], iteration_bounds = array<i64: 1>, scalar_prefetch = 0 : i64, scratch_operands = 0 : i64, tpu.core_type = #tpu.core_type<tc>, window_params = [{transform_indices = @transform_0, window_bounds = array<i64: 8, 12>}, {transform_indices = @transform_1, window_bounds = array<i64: 8, 4>}, {pipeline_mode = #tpu.pipeline_mode<synchronous>, transform_indices = @transform_2, window_bounds = array<i64: 12, 128>}, {pipeline_mode = #tpu.pipeline_mode<synchronous>, transform_indices = @transform_3, window_bounds = array<i64: 4, 128>}, {pipeline_mode = #tpu.pipeline_mode<synchronous>, transform_indices = @transform_4, window_bounds = array<i64: 1, 128>}, {pipeline_mode = #tpu.pipeline_mode<synchronous>, transform_indices = @transform_5, window_bounds = array<i64: 128, 64>}, {pipeline_mode = #tpu.pipeline_mode<synchronous>, transform_indices = @transform_6, window_bounds = array<i64: 1, 64>}, {pipeline_mode = #tpu.pipeline_mode<synchronous>, transform_indices = @transform_7, window_bounds = array<i64: 1, 64>}, {pipeline_mode = #tpu.pipeline_mode<synchronous>, transform_indices = @transform_8, window_bounds = array<i64: 1, 1>}, {transform_indices = @transform_9, window_bounds = array<i64: 8, 128>}]} {
    %c0 = arith.constant 0 : index
    %c0_0 = arith.constant 0 : index
    %0 = vector.load %arg1[%c0, %c0_0] : memref<8x12xf32, #tpu.memory_space<vmem>>, vector<8x12xf32>
    %c0_1 = arith.constant 0 : index
    %c0_2 = arith.constant 0 : index
    %1 = vector.load %arg3[%c0_1, %c0_2] : memref<12x128xf32, #tpu.memory_space<vmem>>, vector<12x128xf32>
    %cst = arith.constant dense<0.000000e+00> : vector<8x128xf32>
    %2 = tpu.matmul %0, %1, %cst {dimension_numbers = #tpu.dot_dimension_numbers<[1], [0], [0], [1], [0, 0, 1, 1], [], []>} : vector<8x12xf32>, vector<12x128xf32>, vector<8x128xf32> -> vector<8x128xf32>
    %c0_3 = arith.constant 0 : index
    %c0_4 = arith.constant 0 : index
    %3 = vector.load %arg2[%c0_3, %c0_4] : memref<8x4xf32, #tpu.memory_space<vmem>>, vector<8x4xf32>
    %c0_5 = arith.constant 0 : index
    %c0_6 = arith.constant 0 : index
    %4 = vector.load %arg4[%c0_5, %c0_6] : memref<4x128xf32, #tpu.memory_space<vmem>>, vector<4x128xf32>
    %cst_7 = arith.constant dense<0.000000e+00> : vector<8x128xf32>
    %5 = tpu.matmul %3, %4, %cst_7 {dimension_numbers = #tpu.dot_dimension_numbers<[1], [0], [0], [1], [0, 0, 1, 1], [], []>} : vector<8x4xf32>, vector<4x128xf32>, vector<8x128xf32> -> vector<8x128xf32>
    %6 = arith.addf %2, %5 : vector<8x128xf32>
    %c0_8 = arith.constant 0 : index
    %c0_9 = arith.constant 0 : index
    %7 = vector.load %arg5[%c0_8, %c0_9] : memref<1x128xf32, #tpu.memory_space<vmem>>, vector<1x128xf32>
    %8 = vector.broadcast %7 : vector<1x128xf32> to vector<8x128xf32>
    %9 = arith.addf %6, %8 : vector<8x128xf32>
    %cst_10 = arith.constant 0.000000e+00 : f32
    %10 = vector.broadcast %cst_10 : f32 to vector<8x128xf32>
    %11 = arith.maximumf %9, %10 : vector<8x128xf32>
    %c0_11 = arith.constant 0 : index
    %c0_12 = arith.constant 0 : index
    %12 = vector.load %arg6[%c0_11, %c0_12] : memref<128x64xf32, #tpu.memory_space<vmem>>, vector<128x64xf32>
    %cst_13 = arith.constant dense<0.000000e+00> : vector<8x64xf32>
    %13 = tpu.matmul %11, %12, %cst_13 {dimension_numbers = #tpu.dot_dimension_numbers<[1], [0], [0], [1], [0, 0, 1, 1], [], []>} : vector<8x128xf32>, vector<128x64xf32>, vector<8x64xf32> -> vector<8x64xf32>
    %c0_14 = arith.constant 0 : index
    %c0_15 = arith.constant 0 : index
    %14 = vector.load %arg7[%c0_14, %c0_15] : memref<1x64xf32, #tpu.memory_space<vmem>>, vector<1x64xf32>
    %15 = vector.broadcast %14 : vector<1x64xf32> to vector<8x64xf32>
    %16 = arith.addf %13, %15 : vector<8x64xf32>
    %cst_16 = arith.constant 0.000000e+00 : f32
    %17 = vector.broadcast %cst_16 : f32 to vector<8x64xf32>
    %18 = arith.maximumf %16, %17 : vector<8x64xf32>
    %c0_17 = arith.constant 0 : index
    %c0_18 = arith.constant 0 : index
    %19 = vector.load %arg8[%c0_17, %c0_18] : memref<1x64xf32, #tpu.memory_space<vmem>>, vector<1x64xf32>
    %20 = vector.broadcast %19 : vector<1x64xf32> to vector<8x64xf32>
    %21 = arith.mulf %18, %20 : vector<8x64xf32>
    %cst_19 = arith.constant dense<0.000000e+00> : vector<8xf32>
    %22 = vector.multi_reduction <add>, %21, %cst_19 [1] : vector<8x64xf32> to vector<8xf32>
    %23 = vector.shape_cast %22 : vector<8xf32> to vector<8x1xf32>
    %c0_20 = arith.constant 0 : index
    %c0_21 = arith.constant 0 : index
    %24 = vector.load %arg9[%c0_20, %c0_21] : memref<1x1xf32, #tpu.memory_space<vmem>>, vector<1x1xf32>
    %25 = vector.broadcast %24 : vector<1x1xf32> to vector<8x1xf32>
    %26 = arith.addf %23, %25 : vector<8x1xf32>
    %27 = vector.shape_cast %26 : vector<8x1xf32> to vector<8x1xf32>
    %28 = vector.broadcast %27 : vector<8x1xf32> to vector<8x128xf32>
    %c0_22 = arith.constant 0 : index
    %c0_23 = arith.constant 0 : index
    %29 = vector.load %arg10[%c0_22, %c0_23] : memref<8x128xf32, #tpu.memory_space<vmem>>, vector<8x128xf32>
    tpu.vector_store %arg10[%c0_22, %c0_23], %28 {strides = array<i32>} : memref<8x128xf32, #tpu.memory_space<vmem>>, vector<8x128xf32>,
    return
  }
  func.func @transform_0(%arg0: i32) -> (i32, i32) {
    %c0_i32 = arith.constant 0 : i32
    %c0_i32_0 = arith.constant 0 : i32
    return %arg0, %c0_i32 : i32, i32
  }
  func.func @transform_1(%arg0: i32) -> (i32, i32) {
    %c0_i32 = arith.constant 0 : i32
    %c0_i32_0 = arith.constant 0 : i32
    return %arg0, %c0_i32 : i32, i32
  }
  func.func @transform_2(%arg0: i32) -> (i32, i32) {
    %c0_i32 = arith.constant 0 : i32
    %c0_i32_0 = arith.constant 0 : i32
    %c0_i32_1 = arith.constant 0 : i32
    return %c0_i32, %c0_i32_0 : i32, i32
  }
  func.func @transform_3(%arg0: i32) -> (i32, i32) {
    %c0_i32 = arith.constant 0 : i32
    %c0_i32_0 = arith.constant 0 : i32
    %c0_i32_1 = arith.constant 0 : i32
    return %c0_i32, %c0_i32_0 : i32, i32
  }
  func.func @transform_4(%arg0: i32) -> (i32, i32) {
    %c0_i32 = arith.constant 0 : i32
    %c0_i32_0 = arith.constant 0 : i32
    %c0_i32_1 = arith.constant 0 : i32
    return %c0_i32, %c0_i32_0 : i32, i32
  }
  func.func @transform_5(%arg0: i32) -> (i32, i32) {
    %c0_i32 = arith.constant 0 : i32
    %c0_i32_0 = arith.constant 0 : i32
    %c0_i32_1 = arith.constant 0 : i32
    return %c0_i32, %c0_i32_0 : i32, i32
  }
  func.func @transform_6(%arg0: i32) -> (i32, i32) {
    %c0_i32 = arith.constant 0 : i32
    %c0_i32_0 = arith.constant 0 : i32
    %c0_i32_1 = arith.constant 0 : i32
    return %c0_i32, %c0_i32_0 : i32, i32
  }
  func.func @transform_7(%arg0: i32) -> (i32, i32) {
    %c0_i32 = arith.constant 0 : i32
    %c0_i32_0 = arith.constant 0 : i32
    %c0_i32_1 = arith.constant 0 : i32
    return %c0_i32, %c0_i32_0 : i32, i32
  }
  func.func @transform_8(%arg0: i32) -> (i32, i32) {
    %c0_i32 = arith.constant 0 : i32
    %c0_i32_0 = arith.constant 0 : i32
    %c0_i32_1 = arith.constant 0 : i32
    return %c0_i32, %c0_i32_0 : i32, i32
  }
  func.func @transform_9(%arg0: i32) -> (i32, i32) {
    %c0_i32 = arith.constant 0 : i32
    %c0_i32_0 = arith.constant 0 : i32
    return %arg0, %c0_i32 : i32, i32
  }
}

</mosaic_0001>

<bundles_post_ra>
// kernel: critic_forward.1
= control target key start
LH: loop header
LB: loop body
LE: loop exit
PB: predicated region body
PF: predicated region fallthrough
CT: control target
= control target key end

     0   :  { %vm43_vm0 = vcmask 1043456   ;;  %v438_v0 = vmov 0.0   ;;  %vm439_vm1 = vmmov 0   ;;  %vm39_vm2 = vcmask 31744   ;;  %s580_s3 = inlined_call_operand.vmem [shape: f32[4,128], index: 3, kind: input, shape index: {}]   ;;  %s581_s1 = inlined_call_operand.vmem [shape: f32[8,4], index: 1, kind: input, shape index: {}]   ;;  %s582_s2 = inlined_call_operand.vmem [shape: f32[12,128], index: 2, kind: input, shape index: {}]   ;;  %s583_s5 = inlined_call_operand.vmem [shape: f32[128,64], index: 5, kind: input, shape index: {}]   ;;  %s584_s0 = inlined_call_operand.vmem [shape: f32[8,12], index: 0, kind: input, shape index: {}]   ;;  %s585_s4 = inlined_call_operand.vmem [shape: f32[1,128], index: 4, kind: input, shape index: {}]   ;;  %s586_s8 = inlined_call_operand.<no memory space> [shape: f32[1,1], index: 8, kind: input, shape index: {}]   ;;  %s587_s6 = inlined_call_operand.vmem [shape: f32[1,64], index: 6, kind: input, shape index: {}]   ;;  %s588_s7 = inlined_call_operand.vmem [shape: f32[1,64], index: 7, kind: input, shape index: {}]   ;;  %s589_s9 = inlined_call_operand.vmem [shape: f32[8,128], index: 9, kind: output, shape index: {}]  }
   0x1   :  { %357 = vmatprep.subr.mxu1 %v438_v0  ;;  %v38_v1 = vld [vmem:[%s580_s3] sm:$0xf]  ;;  %359 = vmatprep.mubr.msk.f32.mxu1 %vm439_vm1, %v438_v0  ;;  %vm440_vm3 = vmmov 1   ;;  %v36_v5 = vld [vmem:[%s582_s2 + $0x8] sm:$0xf]  ;;  %v441_v6 = vmov 0.0|0.0   ;;  %v14_v41 = vstv %s586_s8 }
   0x2   :  { %v37_v2 = vld [vmem:[%s581_s1] sm:$0xff]  ;;  %358 = vmatpush3.msk.msra.mxu1 %vm43_vm0, %v38_v1  ;;  %vm500_vm4 = vmpackc.low %vm43_vm0, %vm440_vm3  ;;  %408 = vmatprep.subr.bf16.mxu0 %v441_v6  ;;  %v204_v9 = vld [vmem:[%s583_s5 + $0x8] sm:$0xff]  ;;  %vm117_vm5 = vcmask 97280   ;;  %15 = vst [vmem:[#allocation2] sm:$0x1] %v14_v41  ;;  %vm305_vm6 = vcmask 523264  }
   0x3   :  { %v35_v4 = vld [vmem:[%s582_s2] sm:$0xff]  ;;  %360 = vmatmul.mubr.msk.f32.vlgmr.msra.gmra.mrb[0].mxu1 %vm39_vm2, %v37_v2  ;;  %404 = vmatprep.subr.bf16.mxu1 %v441_v6  ;;  %v205_v10 = vld [vmem:[%s583_s5 + $0x10] sm:$0xff]  ;;  %v206_v12 = vld [vmem:[%s583_s5 + $0x18] sm:$0xff]  ;;  %v442_v50 = vmov 0  }
   0x4   :  { %v405_v7 = vpack.c.bf16 %v36_v5, %v35_v4  ;;  %v203_v8 = vld [vmem:[%s583_s5] sm:$0xff]  ;;  %366 = vmatprep.mubr.msk.f32.mxu1 %vm439_vm1, %v438_v0  ;;  %401 = vmatprep.mubr.msk.f32.mxu0 %vm439_vm1, %v438_v0  ;;  %v412_v14 = vpack.c.bf16 %v206_v12, %v205_v10  ;;  %v208_v16 = vld [vmem:[%s583_s5 + $0x28] sm:$0xff]  ;;  %v209_v18 = vld [vmem:[%s583_s5 + $0x30] sm:$0xff] }
   0x5   :  { %v409_v11 = vpack.c.bf16 %v204_v9, %v203_v8  ;;  %v34_v13 = vld [vmem:[%s584_s0] sm:$0xff]  ;;  %v210_v19 = vld [vmem:[%s583_s5 + $0x38] sm:$0xff]  ;;  %v212_v22 = vld [vmem:[%s583_s5 + $0x48] sm:$0xff]  ;;  %437 = vset.pattern.permute.xlu0 %v442_v50 }
   0x6   :  { %407 = vmatpush3.bf16.msk.msra.mxu1 %vm500_vm4, %v405_v7  ;;  %v207_v15 = vld [vmem:[%s583_s5 + $0x20] sm:$0xff]  ;;  %v418_v20 = vpack.c.bf16 %v210_v19, %v209_v18  ;;  %v213_v24 = vld [vmem:[%s583_s5 + $0x50] sm:$0xff]  ;;  %v214_v25 = vld [vmem:[%s583_s5 + $0x58] sm:$0xff] }
   0x7   :  { %410 = vmatpush3.bf16.msra.mxu0 %v409_v11  ;;  %v415_v17 = vpack.c.bf16 %v208_v16, %v207_v15  ;;  %v211_v21 = vld [vmem:[%s583_s5 + $0x40] sm:$0xff]  ;;  %v424_v26 = vpack.c.bf16 %v214_v25, %v213_v24  ;;  %v216_v28 = vld [vmem:[%s583_s5 + $0x68] sm:$0xff]  ;;  %v217_v30 = vld [vmem:[%s583_s5 + $0x70] sm:$0xff] }
   0x8   :  { %411 = vmatprep.subr.bf16.mxu0 %v441_v6  ;;  %v421_v23 = vpack.c.bf16 %v212_v22, %v211_v21  ;;  %v215_v27 = vld [vmem:[%s583_s5 + $0x60] sm:$0xff]  ;;  %v218_v31 = vld [vmem:[%s583_s5 + $0x78] sm:$0xff] }
   0x9   :  { %367 = vmatmul.mubr.msk.f32.vlgmr.msra.gmra.mrb[2].mxu1 %vm117_vm5, %v34_v13  ;;  %v427_v29 = vpack.c.bf16 %v216_v28, %v215_v27  ;;  %v430_v32 = vpack.c.bf16 %v218_v31, %v217_v30  ;;  %v331_v36 = vld [vmem:[%s585_s4] ss:$0 sm:$0xff] }
   0xa   :  { %v332_v42 = vld [vmem:[%s587_s6] ss:$0 sm:$0xff] }
   0xb   :  { %413 = vmatpush3.bf16.msra.mxu0 %v412_v14  ;;  %v333_v46 = vld [vmem:[%s588_s7] ss:$0 sm:$0xff] }
   0xc   :  { %414 = vmatprep.subr.bf16.mxu0 %v441_v6  ;;  %v334_v51 = vld [vmem:[#allocation2] ss:$0 sm:$0xff] }
   0xf   :  { %416 = vmatpush3.bf16.msra.mxu0 %v415_v17 }
  0x10   :  { %417 = vmatprep.subr.bf16.mxu0 %v441_v6 }
  0x13   :  { %419 = vmatpush3.bf16.msra.mxu0 %v418_v20 }
  0x14   :  { %420 = vmatprep.subr.bf16.mxu0 %v441_v6 }
  0x17   :  { %422 = vmatpush3.bf16.msra.mxu0 %v421_v23 }
  0x18   :  { %423 = vmatprep.subr.bf16.mxu0 %v441_v6 }
  0x1b   :  { %425 = vmatpush3.bf16.msra.mxu0 %v424_v26 }
  0x1c   :  { %426 = vmatprep.subr.bf16.mxu0 %v441_v6 }
  0x1f   :  { %428 = vmatpush3.bf16.msra.mxu0 %v427_v29 }
  0x20   :  { %429 = vmatprep.subr.bf16.mxu0 %v441_v6 }
  0x23   :  { %431 = vmatpush3.bf16.msra.mxu0 %v430_v32 }
  0xd6   :  { %v113_v33 = vpop.f32.mrb[0].mxu1 }
  0xd7   :  { %v361_v34 = vpop.f32.mrb[1].mxu1 }
  0xdc   :  { %v190_v35 = vpop.f32.mrb[2].mxu1 }
  0xdd   :  { %v191_v37 = vadd.f32 %v190_v35, %v113_v33  ;;  %v368_v38 = vpop.f32.mrb[3].mxu1 }
  0xdf   :  { %v201_v39 = vadd.f32 %v331_v36, %v191_v37 }
  0xe1   :  { %v202_v40 = vmax.f32 %v201_v39, 0.0 }
  0xe3   :  { %402 = vmatmul.mubr.f32.vlgmr.msra.gmra.mrb[0].mxu0 %v202_v40 }
 0x1b6   :  { %v292_v43 = vpop.f32.mrb[0].mxu0 }
 0x1b7   :  { %v293_v44 = vadd.f32 %v332_v42, %v292_v43  ;;  %v403_v45 = vpop.f32.mrb[1].mxu0 }
 0x1b9   :  { %v296_v47 = vmax.f32 %v293_v44, 0.0 }
 0x1bb   :  { %v304_v48 = vmul.f32 %v333_v46, %v296_v47 }
 0x1bd   :  { %v306_v49 = vsel %vm305_vm6, %v304_v48, 0.0 }
 0x1be   :  { %307 = vadd.xlane.f32.xlu0 %v306_v49 }
 0x24b   :  { %v308_v52 = vpop.xlane.xlu0 %307 }
 0x24c   :  { %v316_v53 = vadd.f32 %v334_v51, %v308_v52 }
 0x24e   :  { %319 = vperm.xlu0 %437, %v316_v53  }
 0x2cd   :  { %v320_v54 = vpop.permute.xlu0 %319 }
 0x2ce   :  { %322 = vst [vmem:[%s589_s9] sm:$0xff] %v320_v54 }

</bundles_post_ra>
